<compile_context>
chip_gen: v6e
topology: v6e:2x2x1
jax: 0.10.0
libtpu: 0.0.40
codegen_flags: <defaults>
</compile_context>

<pallas_src>
import functools

import jax
import jax.numpy as jnp
from jax.experimental import pallas as pl
from jax.experimental.pallas import tpu as pltpu

_EPS = 1e-5
_SLOPE = 0.2


def _round_up(x, m):
    return (x + m - 1) // m * m


def _largest_divisor_leq(n, cap):
    cap = max(1, min(n, cap))
    for d in range(cap, 0, -1):
        if n % d == 0:
            return d
    return 1


# ---------- Pass 1: conv (4 MXU matmuls / sample) + per-sample BN partial stats
def _conv_stats_kernel(ow, mv, f_ref, w_ref, y_ref, stats_ref):
    # f_ref:     (1, 2, (OH+1)*OW, 4*Cin_pad) bf16   dw-shifted phase slabs
    # w_ref:     (4, 4*Cin_pad, c_pad)        bf16   weight block per (dh, dw)
    # y_ref:     (1, c_pad, Mv)               bf16   conv out, channel-major
    # stats_ref: (1, 2, c_pad)                f32    per-sample [sum; sumsq]
    acc = None
    for dh in range(2):
        for dw in range(2):
            lhs = f_ref[0, dw, pl.ds(dh * ow, mv), :]          # (Mv, 4*Cin_pad)
            part = jnp.dot(lhs, w_ref[dh * 2 + dw],
                           preferred_element_type=jnp.float32)  # (Mv, c_pad)
            acc = part if acc is None else acc + part
    # BN partial statistics from the f32 accumulator (before the bf16 cast).
    s = jnp.sum(acc, axis=0, keepdims=True)                     # (1, c_pad)
    ss = jnp.sum(acc * acc, axis=0, keepdims=True)              # (1, c_pad)
    stats_ref[0, pl.ds(0, 1), :] = s
    stats_ref[0, pl.ds(1, 1), :] = ss
    # Channel-major write so the final NCHW output needs no XLA transpose.
    y_ref[0] = acc.T.astype(y_ref.dtype)                        # (c_pad, Mv)


# ---------- Pass 2: y*scale + shift, LeakyReLU(0.2) (pure streaming) ----------
def _bn_lrelu_kernel(nout, y_ref, scale_ref, shift_ref, o_ref):
    yv = y_ref[:, pl.ds(0, nout), :].astype(jnp.float32)        # (bs, nout, Mv)
    sc = scale_ref[pl.ds(0, nout), :]                           # (nout, 1)
    sh = shift_ref[pl.ds(0, nout), :]
    z = yv * sc + sh
    o_ref[...] = jnp.where(z >= 0, z, _SLOPE * z)


@jax.jit
def dcgan_conv_forward(x, weight, bias, gamma, beta):
    """x: (N, nin, H, W); weight: (nout, nin, 4, 4); bias/gamma/beta: (nout,)."""
    del bias  # A per-channel constant before train-mode BN is cancelled exactly
              # by the mean subtraction; dropping it is numerically identical.
    n, cin, h, w = x.shape
    nout = weight.shape[0]
    assert h % 2 == 0 and w % 2 == 0
    oh, ow = h // 2, w // 2
    mv = oh * ow                       # output spatial positions per sample
    rows = (oh + 1) * ow               # phase-slab rows per dw variant
    cin_pad = _round_up(cin, 8)
    k4 = 4 * cin_pad                   # contracting dim per (dh, dw) matmul
    c_pad = _round_up(nout, 128)       # lane-dense MXU columns

    # ---- input prep (XLA): phase decomposition + dw shift, ~2x input in bf16.
    # x_pad[2*oh+kh, 2*ow+kw] with kh=2*dh+ph, kw=2*dw+pw  ==  phase (ph,pw)
    # slab at (oh+dh, ow+dw); flattening rows with stride OW turns the dh shift
    # into a contiguous row offset of dh*OW, so the kernel needs no reshapes.
    x_nhwc = jnp.transpose(x, (0, 2, 3, 1)).astype(jnp.bfloat16)
    x_p = jnp.pad(x_nhwc, ((0, 0), (1, 1), (1, 1), (0, cin_pad - cin)))
    phases = [x_p[:, ph::2, pw::2, :] for ph in range(2) for pw in range(2)]
    xph = jnp.concatenate(phases, axis=-1)          # (N, OH+1, OW+1, 4*Cin_pad)
    f_all = jnp.stack(
        [xph[:, :, dw:dw + ow, :].reshape(n, rows, k4) for dw in range(2)],
        axis=1)                                     # (N, 2, rows, 4*Cin_pad)

    # ---- weights: one (4*Cin_pad, c_pad) block per (dh, dw), rows = (ph,pw,ci)
    wt = jnp.transpose(weight, (2, 3, 1, 0))        # (kh, kw, ci, co)
    wt = jnp.pad(wt, ((0, 0), (0, 0), (0, cin_pad - cin), (0, c_pad - nout)))
    wt = wt.reshape(2, 2, 2, 2, cin_pad, c_pad)     # (dh, ph, dw, pw, ci, co)
    w_all = jnp.transpose(wt, (0, 2, 1, 3, 4, 5)).reshape(4, k4, c_pad)
    w_all = w_all.astype(jnp.bfloat16)

    cost = pl.CostEstimate(
        flops=2 * n * mv * 16 * cin_pad * c_pad,
        transcendentals=0,
        bytes_accessed=(f_all.size * 2 + w_all.size * 2
                        + n * c_pad * mv * 2 + n * 2 * c_pad * 4),
    )

    y, stats = pl.pallas_call(
        functools.partial(_conv_stats_kernel, ow, mv),
        out_shape=(
            jax.ShapeDtypeStruct((n, c_pad, mv), jnp.bfloat16),  # conv out (bf16)
            jax.ShapeDtypeStruct((n, 2, c_pad), jnp.float32),    # [sum; sumsq]
        ),
        grid=(n,),
        in_specs=[
            pl.BlockSpec((1, 2, rows, k4), lambda i: (i, 0, 0, 0)),
            pl.BlockSpec((4, k4, c_pad), lambda i: (0, 0, 0)),   # VMEM-resident W
        ],
        out_specs=(
            pl.BlockSpec((1, c_pad, mv), lambda i: (i, 0, 0)),
            pl.BlockSpec((1, 2, c_pad), lambda i: (i, 0, 0)),
        ),
        compiler_params=pltpu.CompilerParams(
            dimension_semantics=("parallel",),
            vmem_limit_bytes=32 * 1024 * 1024),
        cost_estimate=cost,
    )(f_all, w_all)

    # ---- batch statistics -> per-channel affine (tiny, XLA) -------------------
    tot = jnp.sum(stats, axis=0)                    # (2, c_pad)
    inv_m = 1.0 / float(n * mv)
    mean = tot[0] * inv_m
    var = jnp.maximum(tot[1] * inv_m - mean * mean, 0.0)
    rstd = jax.lax.rsqrt(var + _EPS)
    gamma_p = jnp.pad(gamma.astype(jnp.float32), (0, c_pad - nout))
    beta_p = jnp.pad(beta.astype(jnp.float32), (0, c_pad - nout))
    scale = (gamma_p * rstd).reshape(c_pad, 1)
    shift = (beta_p - mean * gamma_p * rstd).reshape(c_pad, 1)

    # ---- pass 2: streaming BN-affine + LeakyReLU, writes (N, nout, OH*OW) -----
    bs = _largest_divisor_leq(n, max(1, (1 << 20) // (c_pad * mv)))
    out3 = pl.pallas_call(
        functools.partial(_bn_lrelu_kernel, nout),
        out_shape=jax.ShapeDtypeStruct((n, nout, mv), jnp.float32),
        grid=(n // bs,),
        in_specs=[
            pl.BlockSpec((bs, c_pad, mv), lambda i: (i, 0, 0)),
            pl.BlockSpec((c_pad, 1), lambda i: (0, 0)),
            pl.BlockSpec((c_pad, 1), lambda i: (0, 0)),
        ],
        out_specs=pl.BlockSpec((bs, nout, mv), lambda i: (i, 0, 0)),
        compiler_params=pltpu.CompilerParams(
            dimension_semantics=("parallel",),
            vmem_limit_bytes=32 * 1024 * 1024),
    )(y, scale, shift)

    # Free reshape (no transpose): row order of Mv is (oh, ow) -> NCHW directly.
    return out3.reshape(n, nout, oh, ow)


def _reference(x, weight, bias, gamma, beta):
    y = jax.lax.conv_general_dilated(
        x, weight, window_strides=(2, 2), padding=((1, 1), (1, 1)),
        dimension_numbers=("NCHW", "OIHW", "NCHW"))
    y = y + bias.reshape(1, -1, 1, 1)
    mean = jnp.mean(y, axis=(0, 2, 3), keepdims=True)
    var = jnp.mean((y - mean) ** 2, axis=(0, 2, 3), keepdims=True)
    z = (y - mean) * jax.lax.rsqrt(var + _EPS)
    z = z * gamma.reshape(1, -1, 1, 1) + beta.reshape(1, -1, 1, 1)
    return jnp.where(z >= 0, z, _SLOPE * z)


if __name__ == "__main__":
    # Small shapes consistent with the module: N=2, nin=4, H=W=16, nout=8
    N, NIN, H, W = 2, 4, 16, 16
    NOUT = 8

    key = jax.random.PRNGKey(0)
    kx, kw_, kb = jax.random.split(key, 3)
    x = jax.random.normal(kx, (N, NIN, H, W), dtype=jnp.float32)
    weight = 0.05 * jax.random.normal(kw_, (NOUT, NIN, 4, 4), dtype=jnp.float32)
    bias = 0.05 * jax.random.normal(kb, (NOUT,), dtype=jnp.float32)
    gamma = jnp.ones((NOUT,), dtype=jnp.float32)
    beta = jnp.zeros((NOUT,), dtype=jnp.float32)

    out = dcgan_conv_forward(x, weight, bias, gamma, beta)
    out = jax.block_until_ready(out)
    assert out.shape == (N, NOUT, H // 2, W // 2), out.shape

    ref = _reference(x, weight, bias, gamma, beta)
    err = float(jnp.max(jnp.abs(out - ref)))
    assert err < 5e-2, f"max abs error vs reference = {err}"
    print("KERNEL_OK")
</pallas_src>

<mosaic_0001>
module attributes {stable_mosaic.version = 11 : i64} {
  func.func @_conv_stats_kernel(%arg0: i32, %arg1: memref<1x2x72x32xbf16, #tpu.memory_space<vmem>>, %arg2: memref<4x32x128xbf16, #tpu.memory_space<vmem>>, %arg3: memref<1x128x64xbf16, #tpu.memory_space<vmem>>, %arg4: memref<1x2x128xf32, #tpu.memory_space<vmem>>) attributes {dimension_semantics = [#tpu.dimension_semantics<parallel>], iteration_bounds = array<i64: 2>, scalar_prefetch = 0 : i64, scratch_operands = 0 : i64, tpu.core_type = #tpu.core_type<tc>, window_params = [{transform_indices = @transform_0, window_bounds = array<i64: 1, 2, 72, 32>}, {pipeline_mode = #tpu.pipeline_mode<synchronous>, transform_indices = @transform_1, window_bounds = array<i64: 4, 32, 128>}, {transform_indices = @transform_2, window_bounds = array<i64: 1, 128, 64>}, {transform_indices = @transform_3, window_bounds = array<i64: 1, 2, 128>}]} {
    %c0 = arith.constant 0 : index
    %c0_0 = arith.constant 0 : index
    %c0_1 = arith.constant 0 : index
    %c0_2 = arith.constant 0 : index
    %0 = vector.load %arg1[%c0, %c0_0, %c0_1, %c0_2] : memref<1x2x72x32xbf16, #tpu.memory_space<vmem>>, vector<1x1x64x32xbf16>
    %1 = vector.shape_cast %0 : vector<1x1x64x32xbf16> to vector<64x32xbf16>
    %c0_3 = arith.constant 0 : index
    %c0_4 = arith.constant 0 : index
    %c0_5 = arith.constant 0 : index
    %2 = vector.load %arg2[%c0_3, %c0_4, %c0_5] : memref<4x32x128xbf16, #tpu.memory_space<vmem>>, vector<1x32x128xbf16>
    %3 = vector.shape_cast %2 : vector<1x32x128xbf16> to vector<32x128xbf16>
    %cst = arith.constant dense<0.000000e+00> : vector<64x128xf32>
    %4 = tpu.matmul %1, %3, %cst {dimension_numbers = #tpu.dot_dimension_numbers<[1], [0], [0], [1], [0, 0, 1, 1], [], []>} : vector<64x32xbf16>, vector<32x128xbf16>, vector<64x128xf32> -> vector<64x128xf32>
    %c0_6 = arith.constant 0 : index
    %c1 = arith.constant 1 : index
    %c0_7 = arith.constant 0 : index
    %c0_8 = arith.constant 0 : index
    %5 = vector.load %arg1[%c0_6, %c1, %c0_7, %c0_8] : memref<1x2x72x32xbf16, #tpu.memory_space<vmem>>, vector<1x1x64x32xbf16>
    %6 = vector.shape_cast %5 : vector<1x1x64x32xbf16> to vector<64x32xbf16>
    %c1_9 = arith.constant 1 : index
    %c0_10 = arith.constant 0 : index
    %c0_11 = arith.constant 0 : index
    %7 = vector.load %arg2[%c1_9, %c0_10, %c0_11] : memref<4x32x128xbf16, #tpu.memory_space<vmem>>, vector<1x32x128xbf16>
    %8 = vector.shape_cast %7 : vector<1x32x128xbf16> to vector<32x128xbf16>
    %cst_12 = arith.constant dense<0.000000e+00> : vector<64x128xf32>
    %9 = tpu.matmul %6, %8, %cst_12 {dimension_numbers = #tpu.dot_dimension_numbers<[1], [0], [0], [1], [0, 0, 1, 1], [], []>} : vector<64x32xbf16>, vector<32x128xbf16>, vector<64x128xf32> -> vector<64x128xf32>
    %10 = arith.addf %4, %9 : vector<64x128xf32>
    %c0_13 = arith.constant 0 : index
    %c0_14 = arith.constant 0 : index
    %c8 = arith.constant 8 : index
    %c0_15 = arith.constant 0 : index
    %11 = vector.load %arg1[%c0_13, %c0_14, %c8, %c0_15] : memref<1x2x72x32xbf16, #tpu.memory_space<vmem>>, vector<1x1x64x32xbf16>
    %12 = vector.shape_cast %11 : vector<1x1x64x32xbf16> to vector<64x32xbf16>
    %c2 = arith.constant 2 : index
    %c0_16 = arith.constant 0 : index
    %c0_17 = arith.constant 0 : index
    %13 = vector.load %arg2[%c2, %c0_16, %c0_17] : memref<4x32x128xbf16, #tpu.memory_space<vmem>>, vector<1x32x128xbf16>
    %14 = vector.shape_cast %13 : vector<1x32x128xbf16> to vector<32x128xbf16>
    %cst_18 = arith.constant dense<0.000000e+00> : vector<64x128xf32>
    %15 = tpu.matmul %12, %14, %cst_18 {dimension_numbers = #tpu.dot_dimension_numbers<[1], [0], [0], [1], [0, 0, 1, 1], [], []>} : vector<64x32xbf16>, vector<32x128xbf16>, vector<64x128xf32> -> vector<64x128xf32>
    %16 = arith.addf %10, %15 : vector<64x128xf32>
    %c0_19 = arith.constant 0 : index
    %c1_20 = arith.constant 1 : index
    %c8_21 = arith.constant 8 : index
    %c0_22 = arith.constant 0 : index
    %17 = vector.load %arg1[%c0_19, %c1_20, %c8_21, %c0_22] : memref<1x2x72x32xbf16, #tpu.memory_space<vmem>>, vector<1x1x64x32xbf16>
    %18 = vector.shape_cast %17 : vector<1x1x64x32xbf16> to vector<64x32xbf16>
    %c3 = arith.constant 3 : index
    %c0_23 = arith.constant 0 : index
    %c0_24 = arith.constant 0 : index
    %19 = vector.load %arg2[%c3, %c0_23, %c0_24] : memref<4x32x128xbf16, #tpu.memory_space<vmem>>, vector<1x32x128xbf16>
    %20 = vector.shape_cast %19 : vector<1x32x128xbf16> to vector<32x128xbf16>
    %cst_25 = arith.constant dense<0.000000e+00> : vector<64x128xf32>
    %21 = tpu.matmul %18, %20, %cst_25 {dimension_numbers = #tpu.dot_dimension_numbers<[1], [0], [0], [1], [0, 0, 1, 1], [], []>} : vector<64x32xbf16>, vector<32x128xbf16>, vector<64x128xf32> -> vector<64x128xf32>
    %22 = arith.addf %16, %21 : vector<64x128xf32>
    %cst_26 = arith.constant dense<0.000000e+00> : vector<128xf32>
    %23 = vector.multi_reduction <add>, %22, %cst_26 [0] : vector<64x128xf32> to vector<128xf32>
    %24 = vector.shape_cast %23 : vector<128xf32> to vector<1x128xf32>
    %25 = arith.mulf %22, %22 : vector<64x128xf32>
    %cst_27 = arith.constant dense<0.000000e+00> : vector<128xf32>
    %26 = vector.multi_reduction <add>, %25, %cst_27 [0] : vector<64x128xf32> to vector<128xf32>
    %27 = vector.shape_cast %26 : vector<128xf32> to vector<1x128xf32>
    %c0_28 = arith.constant 0 : index
    %c0_29 = arith.constant 0 : index
    %c0_30 = arith.constant 0 : index
    %28 = vector.load %arg4[%c0_28, %c0_29, %c0_30] : memref<1x2x128xf32, #tpu.memory_space<vmem>>, vector<1x1x128xf32>
    %29 = vector.shape_cast %28 : vector<1x1x128xf32> to vector<1x128xf32>
    %30 = vector.shape_cast %24 : vector<1x128xf32> to vector<1x1x128xf32>
    tpu.vector_store %arg4[%c0_28, %c0_29, %c0_30], %30 {strides = array<i32>} : memref<1x2x128xf32, #tpu.memory_space<vmem>>, vector<1x1x128xf32>,
    %c0_31 = arith.constant 0 : index
    %c1_32 = arith.constant 1 : index
    %c0_33 = arith.constant 0 : index
    %31 = vector.load %arg4[%c0_31, %c1_32, %c0_33] : memref<1x2x128xf32, #tpu.memory_space<vmem>>, vector<1x1x128xf32>
    %32 = vector.shape_cast %31 : vector<1x1x128xf32> to vector<1x128xf32>
    %33 = vector.shape_cast %27 : vector<1x128xf32> to vector<1x1x128xf32>
    tpu.vector_store %arg4[%c0_31, %c1_32, %c0_33], %33 {strides = array<i32>} : memref<1x2x128xf32, #tpu.memory_space<vmem>>, vector<1x1x128xf32>,
    %34 = tpu.transpose %22, [1, 0] : vector<64x128xf32> -> vector<128x64xf32>
    %35 = arith.truncf %34 : vector<128x64xf32> to vector<128x64xbf16>
    %c0_34 = arith.constant 0 : index
    %c0_35 = arith.constant 0 : index
    %c0_36 = arith.constant 0 : index
    %36 = vector.load %arg3[%c0_34, %c0_35, %c0_36] : memref<1x128x64xbf16, #tpu.memory_space<vmem>>, vector<1x128x64xbf16>
    %37 = vector.shape_cast %36 : vector<1x128x64xbf16> to vector<128x64xbf16>
    %38 = vector.shape_cast %35 : vector<128x64xbf16> to vector<1x128x64xbf16>
    tpu.vector_store %arg3[%c0_34, %c0_35, %c0_36], %38 {strides = array<i32>} : memref<1x128x64xbf16, #tpu.memory_space<vmem>>, vector<1x128x64xbf16>,
    return
  }
  func.func @transform_0(%arg0: i32) -> (i32, i32, i32, i32) {
    %c0_i32 = arith.constant 0 : i32
    %c0_i32_0 = arith.constant 0 : i32
    %c0_i32_1 = arith.constant 0 : i32
    %c0_i32_2 = arith.constant 0 : i32
    return %arg0, %c0_i32, %c0_i32_0, %c0_i32_1 : i32, i32, i32, i32
  }
  func.func @transform_1(%arg0: i32) -> (i32, i32, i32) {
    %c0_i32 = arith.constant 0 : i32
    %c0_i32_0 = arith.constant 0 : i32
    %c0_i32_1 = arith.constant 0 : i32
    %c0_i32_2 = arith.constant 0 : i32
    return %c0_i32, %c0_i32_0, %c0_i32_1 : i32, i32, i32
  }
  func.func @transform_2(%arg0: i32) -> (i32, i32, i32) {
    %c0_i32 = arith.constant 0 : i32
    %c0_i32_0 = arith.constant 0 : i32
    %c0_i32_1 = arith.constant 0 : i32
    return %arg0, %c0_i32, %c0_i32_0 : i32, i32, i32
  }
  func.func @transform_3(%arg0: i32) -> (i32, i32, i32) {
    %c0_i32 = arith.constant 0 : i32
    %c0_i32_0 = arith.constant 0 : i32
    %c0_i32_1 = arith.constant 0 : i32
    return %arg0, %c0_i32, %c0_i32_0 : i32, i32, i32
  }
}

module attributes {stable_mosaic.version = 11 : i64} {
  func.func @_bn_lrelu_kernel(%arg0: i32, %arg1: memref<2x128x64xbf16, #tpu.memory_space<vmem>>, %arg2: memref<128x1xf32, #tpu.memory_space<vmem>>, %arg3: memref<128x1xf32, #tpu.memory_space<vmem>>, %arg4: memref<2x8x64xf32, #tpu.memory_space<vmem>>) attributes {dimension_semantics = [#tpu.dimension_semantics<parallel>], iteration_bounds = array<i64: 1>, scalar_prefetch = 0 : i64, scratch_operands = 0 : i64, tpu.core_type = #tpu.core_type<tc>, window_params = [{transform_indices = @transform_0, window_bounds = array<i64: 2, 128, 64>}, {pipeline_mode = #tpu.pipeline_mode<synchronous>, transform_indices = @transform_1, window_bounds = array<i64: 128, 1>}, {pipeline_mode = #tpu.pipeline_mode<synchronous>, transform_indices = @transform_2, window_bounds = array<i64: 128, 1>}, {transform_indices = @transform_3, window_bounds = array<i64: 2, 8, 64>}]} {
    %c0 = arith.constant 0 : index
    %c0_0 = arith.constant 0 : index
    %c0_1 = arith.constant 0 : index
    %0 = vector.load %arg1[%c0, %c0_0, %c0_1] : memref<2x128x64xbf16, #tpu.memory_space<vmem>>, vector<2x8x64xbf16>
    %1 = arith.extf %0 : vector<2x8x64xbf16> to vector<2x8x64xf32>
    %c0_2 = arith.constant 0 : index
    %c0_3 = arith.constant 0 : index
    %2 = vector.load %arg2[%c0_2, %c0_3] : memref<128x1xf32, #tpu.memory_space<vmem>>, vector<8x1xf32>
    %c0_4 = arith.constant 0 : index
    %c0_5 = arith.constant 0 : index
    %3 = vector.load %arg3[%c0_4, %c0_5] : memref<128x1xf32, #tpu.memory_space<vmem>>, vector<8x1xf32>
    %4 = vector.shape_cast %2 : vector<8x1xf32> to vector<1x8x1xf32>
    %5 = vector.broadcast %4 : vector<1x8x1xf32> to vector<2x8x64xf32>
    %6 = arith.mulf %1, %5 : vector<2x8x64xf32>
    %7 = vector.shape_cast %3 : vector<8x1xf32> to vector<1x8x1xf32>
    %8 = vector.broadcast %7 : vector<1x8x1xf32> to vector<2x8x64xf32>
    %9 = arith.addf %6, %8 : vector<2x8x64xf32>
    %cst = arith.constant 0.000000e+00 : f32
    %10 = vector.broadcast %cst : f32 to vector<2x8x64xf32>
    %11 = arith.cmpf oge, %9, %10 : vector<2x8x64xf32>
    %cst_6 = arith.constant 2.000000e-01 : f32
    %12 = vector.broadcast %cst_6 : f32 to vector<2x8x64xf32>
    %13 = arith.mulf %12, %9 : vector<2x8x64xf32>
    %14 = arith.select %11, %9, %13 : vector<2x8x64xi1>, vector<2x8x64xf32>
    %c0_7 = arith.constant 0 : index
    %c0_8 = arith.constant 0 : index
    %c0_9 = arith.constant 0 : index
    %15 = vector.load %arg4[%c0_7, %c0_8, %c0_9] : memref<2x8x64xf32, #tpu.memory_space<vmem>>, vector<2x8x64xf32>
    tpu.vector_store %arg4[%c0_7, %c0_8, %c0_9], %14 {strides = array<i32>} : memref<2x8x64xf32, #tpu.memory_space<vmem>>, vector<2x8x64xf32>,
    return
  }
  func.func @transform_0(%arg0: i32) -> (i32, i32, i32) {
    %c0_i32 = arith.constant 0 : i32
    %c0_i32_0 = arith.constant 0 : i32
    %c0_i32_1 = arith.constant 0 : i32
    return %arg0, %c0_i32, %c0_i32_0 : i32, i32, i32
  }
  func.func @transform_1(%arg0: i32) -> (i32, i32) {
    %c0_i32 = arith.constant 0 : i32
    %c0_i32_0 = arith.constant 0 : i32
    %c0_i32_1 = arith.constant 0 : i32
    return %c0_i32, %c0_i32_0 : i32, i32
  }
  func.func @transform_2(%arg0: i32) -> (i32, i32) {
    %c0_i32 = arith.constant 0 : i32
    %c0_i32_0 = arith.constant 0 : i32
    %c0_i32_1 = arith.constant 0 : i32
    return %c0_i32, %c0_i32_0 : i32, i32
  }
  func.func @transform_3(%arg0: i32) -> (i32, i32, i32) {
    %c0_i32 = arith.constant 0 : i32
    %c0_i32_0 = arith.constant 0 : i32
    %c0_i32_1 = arith.constant 0 : i32
    return %arg0, %c0_i32, %c0_i32_0 : i32, i32, i32
  }
}

</mosaic_0001>

<bundles_post_ra>
// kernel: dcgan_conv_forward.3
= control target key start
LH: loop header
LB: loop body
LE: loop exit
PB: predicated region body
PF: predicated region fallthrough
CT: control target
= control target key end

     0   :  { %v49_v0 = vmov 0   ;;  %vm40_vm0 = vcmask 523264   ;;  %s88_s1 = inlined_call_operand.vmem [shape: f32[128,1], index: 1, kind: input, shape index: {}]   ;;  %s89_s2 = inlined_call_operand.vmem [shape: f32[128,1], index: 2, kind: input, shape index: {}]   ;;  %s90_s0 = inlined_call_operand.vmem [shape: bf16[2,128,64], index: 0, kind: input, shape index: {}]   ;;  %s91_s3 = inlined_call_operand.vmem [shape: f32[2,8,64], index: 3, kind: output, shape index: {}]  }
   0x1   :  { %48 = vset.pattern.permute.xlu0 %v49_v0  ;;  %v18_v1 = vld [vmem:[%s88_s1] sm:$0xff] }
   0x2   :  { %22 = vperm.xlu0 %48, %v18_v1   ;;  %v19_v2 = vld [vmem:[%s89_s2] sm:$0xff] }
   0x3   :  { %v14_v3 = vld [vmem:[%s90_s0] sm:$0xf] }
   0x4   :  { %v15_v4 = vld [vmem:[%s90_s0 + $0x40] sm:$0xf]  ;;  %v16_v5 = vunpack.c.l.bf16 %v14_v3 }
   0x5   :  { %v17_v6 = vunpack.c.l.bf16 %v15_v4 }
   0x6   :  { %29 = vperm.xlu0 %48, %v19_v2  }
  0x7d   :  { %v23_v7 = vpop.permute.xlu0 %22 }
  0x7e   :  { %v25_v8 = vmul.f32 %v23_v7, %v16_v5  ;;  %v26_v9 = vmul.f32 %v23_v7, %v17_v6 }
  0x81   :  { %v30_v10 = vpop.permute.xlu0 %29 }
  0x82   :  { %v32_v11 = vadd.f32 %v30_v10, %v25_v8  ;;  %v33_v12 = vadd.f32 %v30_v10, %v26_v9 }
  0x84   :  { %vm34_vm1 = vcmp.ge.f32.partialorder %v32_v11, 0.0  ;;  %vm35_vm2 = vcmp.ge.f32.partialorder %v33_v12, 0.0  ;;  %v36_v13 = vmul.f32 0.2, %v32_v11  ;;  %v37_v14 = vmul.f32 0.2, %v33_v12 }
  0x86   :  { %v38_v15 = vsel %vm34_vm1, %v32_v11, %v36_v13  ;;  %v39_v16 = vsel %vm35_vm2, %v33_v12, %v37_v14 }
  0x87   :  { %41 = vst.msk [vmem:[%s91_s3] sm:$0xff] %vm40_vm0, %v38_v15  ;;  %42 = vst.msk [vmem:[%s91_s3 + $0x8] sm:$0xff] %vm40_vm0, %v39_v16 }

// kernel: dcgan_conv_forward.2
= control target key start
LH: loop header
LB: loop body
LE: loop exit
PB: predicated region body
PF: predicated region fallthrough
CT: control target
= control target key end

     0   :  { %s1169_s12 = smov 0   ;;  %s1286_s0 = inlined_call_operand.vmem [shape: bf16[2,2,72,32], index: 0, kind: input, shape index: {}]   ;;  %s1287_s1 = inlined_call_operand.vmem [shape: bf16[4,32,128], index: 1, kind: input, shape index: {}]   ;;  %s1288_s2 = inlined_call_operand.vmem [shape: bf16[2,128,64], index: 2, kind: output, shape index: {0}]   ;;  %s1289_s3 = inlined_call_operand.vmem [shape: f32[2,2,128], index: 3, kind: output, shape index: {1}]  }
   0x1 LB: > { %s923_s13 = sadd.s32 4294967295, %s1147_s12   ;;  %p927_p0 = scmp.ge.s32.totalorder %s1147_s12, 1  ;;  %s1147_s12 = sphi %s1169_s12, %s14_s12  }
   0x2   : > { %p140_p1 = scmp.lt.s32.totalorder %s1147_s12, 3 }
   0x4   : > { %p141_p2 = pnand %p927_p0, %p140_p1 }
   0x5   : > { %p168_p3 = scmp.lt.s32.totalorder (!%p141_p2), %s923_s13, 1 }
   0x6   : > { %144 = sbr.rel (%p141_p2) target bundleno = 423 (0x1a7), region = 28 }
   0xb   : > { %v1117_v0 = vld [vmem:[%s1287_s1 + $0x18] sm:$0xff]   ;;  %v1118_v1 = vld [vmem:[%s1287_s1 + $0x8] sm:$0xff]   ;;  %v1119_v2 = vld [vmem:[%s1287_s1 + $0x10] sm:$0xff]   ;;  %s1291_s13 = smov (!%p168_p3, %s923_s13), 1  ;;  %vm241_vm0 = vcmask 261120   ;;  %vm820_vm1 = vcmask 519168  }
   0xc   : > { %1059 = vmatprep.subr.bf16.mxu0 %v1117_v0  ;;  %1071 = vmatprep.subr.bf16.mxu1 %v1118_v1  ;;  %v1120_v3 = vld [vmem:[%s1287_s1] sm:$0xff]   ;;  %s1107_s22 = smul.u32 72, %s1291_s13  ;;  %v1125_v4 = vld [vmem:[%s1287_s1 + $0x28] sm:$0xff]   ;;  %v1126_v5 = vld [vmem:[%s1287_s1 + $0x38] sm:$0xff]   ;;  %s931_s7 = sshll.u32 %s1291_s13, 1 }
   0xd   : > { %1060 = vmatpush3.bf16.msra.mxu0 %v1117_v0  ;;  %1072 = vmatpush3.bf16.msra.mxu1 %v1118_v1  ;;  %v1131_v8 = vld [vmem:[%s1287_s1 + $0x20] sm:$0xff]   ;;  %v1132_v15 = vld [vmem:[%s1287_s1 + $0x30] sm:$0xff]   ;;  %s181_s10 = scalar_lea.vmem %s1289_s3, %s931_s7  ;;  %s1018_s11 = sshll.u32 %s1291_s13, 6 }
   0xe   : > { %1061 = vmatprep.subr.bf16.mxu0 %v1119_v2  ;;  %1073 = vmatprep.subr.bf16.mxu1 %v1120_v3  ;;  %s1201_s29 = scalar_lea.vmem %s1286_s0, %s1107_s22  ;;  %s1249_s16 = scalar_lea.vmem %s1288_s2, %s1018_s11 }
   0xf   : > { %v1121_v6 = vld [vmem:[%s1201_s29 + $0x24] sm:$0xff]   ;;  %v1123_v9 = vld [vmem:[%s1201_s29 + $0x2c] sm:$0xff]   ;;  %v1127_v11 = vld [vmem:[%s1201_s29 + $0x34] sm:$0xff]  }
  0x10   : > { %v1122_v7 = vld [vmem:[%s1201_s29] sm:$0xff]   ;;  %1063 = vmatprep.mubr.msk.bf16.mxu0 %vm241_vm0, %v1121_v6  ;;  %v1124_v10 = vld [vmem:[%s1201_s29 + $0x8] sm:$0xff]   ;;  %v1128_v12 = vld [vmem:[%s1201_s29 + $0x10] sm:$0xff]  }
  0x11   : > { %1062 = vmatpush3.bf16.msra.mxu0 %v1119_v2  ;;  %1074 = vmatpush3.bf16.msra.mxu1 %v1120_v3  ;;  %v1129_v13 = vld [vmem:[%s1201_s29 + $0x3c] sm:$0xff]   ;;  %v1133_v16 = vld [vmem:[%s1201_s29 + $0x4] sm:$0xff]   ;;  %v1135_v18 = vld [vmem:[%s1201_s29 + $0xc] sm:$0xff]  }
  0x12   : > { %1083 = vmatprep.subr.bf16.mxu0 %v1125_v4  ;;  %1095 = vmatprep.subr.bf16.mxu1 %v1126_v5  ;;  %v1130_v14 = vld [vmem:[%s1201_s29 + $0x18] sm:$0xff]   ;;  %v1134_v17 = vld [vmem:[%s1201_s29 + $0x28] sm:$0xff]   ;;  %v1136_v19 = vld [vmem:[%s1201_s29 + $0x30] sm:$0xff]  }
  0x13   : > { %1075 = vmatprep.mubr.msk.bf16.mxu1 %vm241_vm0, %v1122_v7  ;;  %v1137_v20 = vld [vmem:[%s1201_s29 + $0x14] sm:$0xff]   ;;  %v1138_v22 = vld [vmem:[%s1201_s29 + $0x1c] sm:$0xff]  }
  0x14   : > { %1064 = vmatmul.mubr.msk.bf16.vlgmr.msra.gmra.mxu0 %vm241_vm0, %v1123_v9  ;;  %1076 = vmatmul.mubr.msk.bf16.vlgmr.msra.gmra.mxu1 %vm241_vm0, %v1124_v10  ;;  %v1139_v21 = vld [vmem:[%s1201_s29 + $0x38] sm:$0xff]   ;;  %v1140_v23 = vld [vmem:[%s1201_s29 + $0x40] sm:$0xff]  }
  0x15   : > { %1084 = vmatpush3.bf16.msra.mxu0 %v1125_v4  ;;  %1096 = vmatpush3.bf16.msra.mxu1 %v1126_v5 }
  0x16   : > { %1067 = vmatprep.mubr.msk.bf16.mxu0 %vm241_vm0, %v1127_v11  ;;  %1079 = vmatprep.mubr.msk.bf16.mxu1 %vm241_vm0, %v1128_v12 }
  0x17   : > { %1085 = vmatprep.subr.bf16.mxu0 %v1131_v8  ;;  %1097 = vmatprep.subr.bf16.mxu1 %v1132_v15 }
  0x19   : > { %1086 = vmatpush3.bf16.msra.mxu0 %v1131_v8  ;;  %1098 = vmatpush3.bf16.msra.mxu1 %v1132_v15 }
  0x1c   : > { %1068 = vmatmul.mubr.msk.bf16.gmra.mxu0 %vm241_vm0, %v1129_v13  ;;  %1080 = vmatmul.mubr.msk.bf16.gmra.mxu1 %vm241_vm0, %v1130_v14 }
  0x1d   : > { %1087 = vmatprep.mubr.msk.bf16.mxu0 %vm241_vm0, %v1133_v16  ;;  %1099 = vmatprep.mubr.msk.bf16.mxu1 %vm241_vm0, %v1134_v17 }
  0x24   : > { %1088 = vmatmul.mubr.msk.bf16.vlgmr.msra.gmra.mxu0 %vm241_vm0, %v1135_v18  ;;  %1100 = vmatmul.mubr.msk.bf16.vlgmr.msra.gmra.mxu1 %vm241_vm0, %v1136_v19 }
  0x25   : > { %1091 = vmatprep.mubr.msk.bf16.mxu0 %vm241_vm0, %v1137_v20  ;;  %1103 = vmatprep.mubr.msk.bf16.mxu1 %vm241_vm0, %v1139_v21 }
  0x2c   : > { %1092 = vmatmul.mubr.msk.bf16.gmra.mxu0 %vm241_vm0, %v1138_v22  ;;  %1104 = vmatmul.mubr.msk.bf16.gmra.mxu1 %vm241_vm0, %v1140_v23 }
  0xd4   : > { %v1065_v24 = vpop.f32.mrf.mxu0  ;;  %v1077_v25 = vpop.f32.mrf.mxu1 }
  0xd5   : > { %v406_v44 = vadd.f32 %v1077_v25, %v1065_v24 }
  0xd6   : > { %v288_v26 = vpop.f32.mrf.mxu0  ;;  %v397_v27 = vpop.f32.mrf.mxu1 }
  0xd7   : > { %v398_v41 = vadd.f32 %v397_v27, %v288_v26 }
  0xd8   : > { %v1066_v28 = vpop.f32.mrf.mxu0  ;;  %v1078_v29 = vpop.f32.mrf.mxu1 }
  0xd9   : > { %v409_v47 = vadd.f32 %v1078_v29, %v1066_v28 }
  0xda   : > { %v291_v30 = vpop.f32.mrf.mxu0  ;;  %v400_v31 = vpop.f32.mrf.mxu1 }
  0xdb   : > { %v401_v49 = vadd.f32 %v400_v31, %v291_v30 }
  0xdc   : > { %v1069_v32 = vpop.f32.mrf.mxu0  ;;  %v1081_v33 = vpop.f32.mrf.mxu1 }
  0xdd   : > { %v422_v62 = vadd.f32 %v1081_v33, %v1069_v32 }
  0xde   : > { %v304_v34 = vpop.f32.mrf.mxu0  ;;  %v413_v35 = vpop.f32.mrf.mxu1 }
  0xdf   : > { %v414_v58 = vadd.f32 %v413_v35, %v304_v34 }
  0xe0   : > { %v1070_v36 = vpop.f32.mrf.mxu0  ;;  %v1082_v37 = vpop.f32.mrf.mxu1 }
  0xe1   : > { %v425_v6 = vadd.f32 %v1082_v37, %v1070_v36 }
  0xe2   : > { %v307_v38 = vpop.f32.mrf.mxu0  ;;  %v416_v39 = vpop.f32.mrf.mxu1 }
  0xe3   : > { %v417_v9 = vadd.f32 %v416_v39, %v307_v38 }
  0xe4   : > { %v1089_v40 = vpop.f32.mrf.mxu0  ;;  %v1101_v42 = vpop.f32.mrf.mxu1 }
  0xe5   : > { %v552_v50 = vadd.f32 %v1089_v40, %v406_v44 }
  0xe6   : > { %v519_v43 = vpop.f32.mrf.mxu0  ;;  %v649_v46 = vpop.f32.mrf.mxu1 }
  0xe7   : > { %v550_v45 = vadd.f32 %v519_v43, %v398_v41  ;;  %v682_v59 = vadd.f32 %v1101_v42, %v552_v50 }
  0xe8   : > { %v1090_v48 = vpop.f32.mrf.mxu0  ;;  %v1102_v52 = vpop.f32.mrf.mxu1 }
  0xe9   : > { %v680_v51 = vadd.f32 %v649_v46, %v550_v45  ;;  %v553_v53 = vadd.f32 %v1090_v48, %v409_v47  ;;  %v703_v10 = vmul.f32 %v682_v59, %v682_v59 }
  0xea   : > { %v522_v54 = vpop.f32.mrf.mxu0  ;;  %v652_v56 = vpop.f32.mrf.mxu1 }
  0xeb   : > { %v551_v55 = vadd.f32 %v522_v54, %v401_v49  ;;  %724 = vxpose.xlu0.b32.start [1/8] (short) %v680_v51, 128  ;;  %v683_v63 = vadd.f32 %v1102_v52, %v553_v53  ;;  %v701_v1 = vmul.f32 %v680_v51, %v680_v51 }
  0xec   : > { %v1093_v57 = vpop.f32.mrf.mxu0  ;;  %v1105_v61 = vpop.f32.mrf.mxu1 }
  0xed   : > { %v681_v60 = vadd.f32 %v652_v56, %v551_v55  ;;  %v556_v7 = vadd.f32 %v1093_v57, %v422_v62  ;;  %v704_v14 = vmul.f32 %v683_v63, %v683_v63 }
  0xee   : > { %v535_v0 = vpop.f32.mrf.mxu0  ;;  %v665_v5 = vpop.f32.mrf.mxu1 }
  0xef   : > { %v688_v2 = vadd.f32 %v681_v60, %v680_v51  ;;  %v702_v3 = vmul.f32 %v681_v60, %v681_v60  ;;  %v554_v4 = vadd.f32 %v535_v0, %v414_v58  ;;  %725 = vxpose.xlu0.b32.cont [2/8] (short) %v681_v60, 128  ;;  %v686_v22 = vadd.f32 %v1105_v61, %v556_v7 }
  0xf0   : > { %v1094_v8 = vpop.f32.mrf.mxu0  ;;  %v1106_v13 = vpop.f32.mrf.mxu1 }
  0xf1   : > { %v689_v11 = vadd.f32 %v688_v2, %v682_v59  ;;  %v709_v12 = vadd.f32 %v702_v3, %v701_v1  ;;  %v684_v15 = vadd.f32 %v665_v5, %v554_v4  ;;  %v557_v18 = vadd.f32 %v1094_v8, %v425_v6 }
  0xf2   : > { %v538_v16 = vpop.f32.mrf.mxu0  ;;  %v668_v21 = vpop.f32.mrf.mxu1  ;;  %v707_v31 = vmul.f32 %v686_v22, %v686_v22 }
  0xf3   : > { %v710_v17 = vadd.f32 %v709_v12, %v703_v10  ;;  %v690_v19 = vadd.f32 %v689_v11, %v683_v63  ;;  %v555_v20 = vadd.f32 %v538_v16, %v417_v9  ;;  %726 = vxpose.xlu0.b32.cont [3/8] (short) %v682_v59, 128  ;;  %v705_v24 = vmul.f32 %v684_v15, %v684_v15 }
  0xf4   : > { %v687_v28 = vadd.f32 %v1106_v13, %v557_v18 }
  0xf5   : > { %v691_v23 = vadd.f32 %v690_v19, %v684_v15  ;;  %v711_v25 = vadd.f32 %v710_v17, %v704_v14  ;;  %v685_v26 = vadd.f32 %v668_v21, %v555_v20 }
  0xf6   : > { %v708_v34 = vmul.f32 %v687_v28, %v687_v28 }
  0xf7   : > { %v712_v27 = vadd.f32 %v711_v25, %v705_v24  ;;  %v692_v29 = vadd.f32 %v691_v23, %v685_v26  ;;  %v706_v30 = vmul.f32 %v685_v26, %v685_v26  ;;  %727 = vxpose.xlu0.b32.cont [4/8] (short) %v683_v63, 128 }
  0xf9   : > { %v693_v32 = vadd.f32 %v692_v29, %v686_v22  ;;  %v713_v33 = vadd.f32 %v712_v27, %v706_v30 }
  0xfb   : > { %v694_v35 = vadd.f32 %v693_v32, %v687_v28  ;;  %v714_v36 = vadd.f32 %v713_v33, %v707_v31  ;;  %728 = vxpose.xlu0.b32.cont [5/8] (short) %v684_v15, 128 }
  0xfd   : > { %v695_v37 = vrot.slane %v694_v35, 4  ;;  %v715_v38 = vadd.f32 %v714_v36, %v708_v34 }
  0xff   : > { %v696_v39 = vadd.f32 %v695_v37, %v694_v35  ;;  %v716_v40 = vrot.slane %v715_v38, 4  ;;  %729 = vxpose.xlu0.b32.cont [6/8] (short) %v685_v26, 128 }
 0x101   : > { %v697_v41 = vrot.slane %v696_v39, 2  ;;  %v717_v42 = vadd.f32 %v716_v40, %v715_v38 }
 0x103   : > { %v698_v43 = vadd.f32 %v697_v41, %v696_v39  ;;  %v718_v44 = vrot.slane %v717_v42, 2  ;;  %730 = vxpose.xlu0.b32.cont [7/8] (short) %v686_v22, 128 }
 0x105   : > { %v699_v45 = vrot.slane %v698_v43, 1  ;;  %v719_v46 = vadd.f32 %v718_v44, %v717_v42 }
 0x107   : > { %v700_v47 = vadd.f32 %v699_v45, %v698_v43  ;;  %v720_v48 = vrot.slane %v719_v46, 1  ;;  %731 = vxpose.xlu0.b32.end [8/8] (short) %v687_v28, 128 }
 0x109   : > { %v721_v49 = vadd.f32 %v720_v48, %v719_v46  ;;  %722 = vst [vmem:[%s181_s10] sm:$0x1] %v700_v47 }
 0x10b   : > { %723 = vst [vmem:[%s181_s10 + $0x1] sm:$0x1] %v721_v49 }
 0x167   : > { %v740_v50 = vpop.trf.xlu0 }
 0x168   : > { %v1019_v51 = vpack.c.bf16 %v740_v50, %v740_v50 }
 0x16a   : > { %821 = vst.msk [vmem:[%s1249_s16] sm:$0xf] %vm820_vm1, %v1019_v51 }
 0x16b   : > { %v741_v52 = vpop.trf.xlu0 }
 0x16c   : > { %v1020_v53 = vpack.c.bf16 %v741_v52, %v741_v52 }
 0x16e   : > { %822 = vst.msk [vmem:[%s1249_s16 + $0x4] sm:$0xf] %vm820_vm1, %v1020_v53 }
 0x16f   : > { %v742_v54 = vpop.trf.xlu0 }
 0x170   : > { %v1021_v55 = vpack.c.bf16 %v742_v54, %v742_v54 }
 0x172   : > { %823 = vst.msk [vmem:[%s1249_s16 + $0x8] sm:$0xf] %vm820_vm1, %v1021_v55 }
 0x173   : > { %v743_v56 = vpop.trf.xlu0 }
 0x174   : > { %v1022_v57 = vpack.c.bf16 %v743_v56, %v743_v56 }
 0x176   : > { %824 = vst.msk [vmem:[%s1249_s16 + $0xc] sm:$0xf] %vm820_vm1, %v1022_v57 }
 0x177   : > { %v744_v58 = vpop.trf.xlu0 }
 0x178   : > { %v1023_v59 = vpack.c.bf16 %v744_v58, %v744_v58 }
 0x17a   : > { %825 = vst.msk [vmem:[%s1249_s16 + $0x10] sm:$0xf] %vm820_vm1, %v1023_v59 }
 0x17b   : > { %v745_v60 = vpop.trf.xlu0 }
 0x17c   : > { %v1024_v61 = vpack.c.bf16 %v745_v60, %v745_v60 }
 0x17e   : > { %826 = vst.msk [vmem:[%s1249_s16 + $0x14] sm:$0xf] %vm820_vm1, %v1024_v61 }
 0x17f   : > { %v746_v62 = vpop.trf.xlu0 }
 0x180   : > { %v1025_v63 = vpack.c.bf16 %v746_v62, %v746_v62 }
 0x182   : > { %827 = vst.msk [vmem:[%s1249_s16 + $0x18] sm:$0xf] %vm820_vm1, %v1025_v63 }
 0x183   : > { %v747_v0 = vpop.trf.xlu0 }
 0x184   : > { %v1026_v1 = vpack.c.bf16 %v747_v0, %v747_v0 }
 0x186   : > { %828 = vst.msk [vmem:[%s1249_s16 + $0x1c] sm:$0xf] %vm820_vm1, %v1026_v1 }
 0x187   : > { %v748_v2 = vpop.trf.xlu0 }
 0x188   : > { %v1027_v3 = vpack.c.bf16 %v748_v2, %v748_v2 }
 0x18a   : > { %829 = vst.msk [vmem:[%s1249_s16 + $0x20] sm:$0xf] %vm820_vm1, %v1027_v3 }
 0x18b   : > { %v749_v4 = vpop.trf.xlu0 }
 0x18c   : > { %v1028_v5 = vpack.c.bf16 %v749_v4, %v749_v4 }
 0x18e   : > { %830 = vst.msk [vmem:[%s1249_s16 + $0x24] sm:$0xf] %vm820_vm1, %v1028_v5 }
 0x18f   : > { %v750_v6 = vpop.trf.xlu0 }
 0x190   : > { %v1029_v7 = vpack.c.bf16 %v750_v6, %v750_v6 }
 0x192   : > { %831 = vst.msk [vmem:[%s1249_s16 + $0x28] sm:$0xf] %vm820_vm1, %v1029_v7 }
 0x193   : > { %v751_v8 = vpop.trf.xlu0 }
 0x194   : > { %v1030_v9 = vpack.c.bf16 %v751_v8, %v751_v8 }
 0x196   : > { %832 = vst.msk [vmem:[%s1249_s16 + $0x2c] sm:$0xf] %vm820_vm1, %v1030_v9 }
 0x197   : > { %v752_v10 = vpop.trf.xlu0 }
 0x198   : > { %v1031_v11 = vpack.c.bf16 %v752_v10, %v752_v10 }
 0x19a   : > { %833 = vst.msk [vmem:[%s1249_s16 + $0x30] sm:$0xf] %vm820_vm1, %v1031_v11 }
 0x19b   : > { %v753_v12 = vpop.trf.xlu0 }
 0x19c   : > { %v1032_v13 = vpack.c.bf16 %v753_v12, %v753_v12 }
 0x19e   : > { %834 = vst.msk [vmem:[%s1249_s16 + $0x34] sm:$0xf] %vm820_vm1, %v1032_v13 }
 0x19f   : > { %v754_v14 = vpop.trf.xlu0 }
 0x1a0   : > { %v1033_v15 = vpack.c.bf16 %v754_v14, %v754_v14 }
 0x1a2   : > { %835 = vst.msk [vmem:[%s1249_s16 + $0x38] sm:$0xf] %vm820_vm1, %v1033_v15 }
 0x1a3   : > { %v755_v16 = vpop.trf.xlu0 }
 0x1a4   : > { %v1034_v17 = vpack.c.bf16 %v755_v16, %v755_v16 }
 0x1a6   : > { %836 = vst.msk [vmem:[%s1249_s16 + $0x3c] sm:$0xf] %vm820_vm1, %v1034_v17 }
 0x1a7 PF: > { %s14_s12 = sadd.s32 1, %s1147_s12  }
 0x1a8   : > { %p11_p4 = scmp.ge.s32.totalorder %s14_s12, 4  }
 0x1aa   :  { %13 = sbr.rel (!%p11_p4) target bundleno = 1 (0x1), region = 74 }

</bundles_post_ra>
